<compile_context>
chip_gen: v6e
topology: v6e:2x2x1
jax: 0.10.0
libtpu: 0.0.40
codegen_flags: <defaults>
</compile_context>

<pallas_src>
import math

import jax
import jax.numpy as jnp
from jax.experimental import pallas as pl
from jax.experimental.pallas import tpu as pltpu


# ----------------------------- Pallas kernel ------------------------------ #
def _make_conv1x1_relu_kernel(cin, use_vpu):
    """Kernel computing o = relu(w @ x + b) on a (Cout, TM) tile, channel-major."""

    def kernel(x_ref, w_ref, b_ref, o_ref):
        # x_ref: (Cin, TM), w_ref: (Cout, Cin), b_ref: (Cout, 1), o_ref: (Cout, TM)
        if use_vpu:
            # Tiny K: unrolled broadcast multiply-add on the VPU (skip MXU fill/drain).
            acc = jnp.broadcast_to(b_ref[...], o_ref.shape).astype(jnp.float32)
            for q in range(cin):  # static unroll over the contraction axis
                acc = acc + w_ref[:, q : q + 1] * x_ref[q : q + 1, :]
            y = acc
        else:
            y = jnp.dot(w_ref[...], x_ref[...], preferred_element_type=jnp.float32)
            y = y + b_ref[...]
        o_ref[...] = jnp.maximum(y, 0.0).astype(o_ref.dtype)

    return kernel


def _pick_tile(m, tm_cap):
    """Largest multiple-of-128 divisor of m that is <= tm_cap (None if there is none)."""
    best = None
    t = 128
    while t <= min(m, tm_cap):
        if m % t == 0:
            best = t
        t += 128
    return best


def conv1x1_relu_nchw(x_flat, w, b, *, tm_cap_max=1024, vmem_budget_bytes=8 << 20):
    """x_flat: (N, Cin, M) (NCHW flattened), w: (Cout, Cin), b: (Cout, 1) -> (N, Cout, M)."""
    N, Cin, M_in = x_flat.shape
    Cout = w.shape[0]
    itemsize = jnp.dtype(x_flat.dtype).itemsize

    # VMEM-aware pixel-tile cap: x-in + y-out blocks, double-buffered, must fit the budget.
    bytes_per_pixel_col = 2 * (Cin + Cout) * itemsize
    tm_cap = (vmem_budget_bytes // bytes_per_pixel_col) // 128 * 128
    tm_cap = int(max(128, min(tm_cap, tm_cap_max)))

    tm = _pick_tile(M_in, tm_cap)
    pad = 0
    if tm is None:
        if M_in * bytes_per_pixel_col <= vmem_budget_bytes:
            tm = M_in            # ragged but small: single full-axis block
        else:
            pad = (-M_in) % 128  # ragged and large: pad pixels -> lane-dense bounded tiles
            tm = _pick_tile(M_in + pad, tm_cap)
    if pad:
        x_flat = jnp.pad(x_flat, ((0, 0), (0, 0), (0, pad)))
    M = M_in + pad
    grid = (N, M // tm)

    use_vpu = (Cin <= 16) and (Cout <= 128)
    kernel = _make_conv1x1_relu_kernel(Cin, use_vpu)

    cost = pl.CostEstimate(
        flops=2 * N * M * Cin * Cout,
        transcendentals=0,
        bytes_accessed=itemsize * (N * Cin * M + Cout * Cin + Cout + N * Cout * M),
    )

    out = pl.pallas_call(
        kernel,
        out_shape=jax.ShapeDtypeStruct((N, Cout, M), x_flat.dtype),
        grid_spec=pltpu.PrefetchScalarGridSpec(
            num_scalar_prefetch=0,
            grid=grid,
            in_specs=[
                pl.BlockSpec((None, Cin, tm), lambda n, m: (n, 0, m)),   # x tile, pixels on lanes
                pl.BlockSpec((Cout, Cin), lambda n, m: (0, 0)),          # weight (VMEM-resident)
                pl.BlockSpec((Cout, 1), lambda n, m: (0, 0)),            # bias (VMEM-resident)
            ],
            out_specs=pl.BlockSpec((None, Cout, tm), lambda n, m: (n, 0, m)),  # lane-dense out
        ),
        compiler_params=pltpu.CompilerParams(
            dimension_semantics=("parallel", "parallel")
        ),
        cost_estimate=cost,
    )(x_flat, w, b)

    if pad:
        out = out[:, :, :M_in]
    return out


# ------------------------------ Module glue ------------------------------- #
def init_params(key, n_channels, scale):
    """Deterministic ICNR init of the 1x1 conv (matches icnr(weight, scale=2) structure).

    PyTorch conv weight W has shape (C*scale^2, C, 1, 1) with W[m, q] = B[m // scale^2, q],
    where B is kaiming-normal (std = sqrt(2 / fan_in), fan_in = C). We store W channel-major
    as (Cout, Cin) for the kernel's w @ x.
    """
    s2 = scale * scale
    k_w, k_b = jax.random.split(key)
    std = math.sqrt(2.0 / n_channels)
    base = jax.random.normal(k_w, (n_channels, n_channels), jnp.float32) * std  # B[p, q]
    w = jnp.repeat(base, s2, axis=0)                  # (C*s2, C): row m = B[m // s2]  (ICNR)
    bound = 1.0 / math.sqrt(n_channels)
    bias = jax.random.uniform(k_b, (n_channels * s2, 1), jnp.float32, -bound, bound)
    return w, bias


def pixel_shuffle_forward(x_nchw, w, bias, scale):
    """Forward pass of PixelShuffle module. x_nchw: (N, C, H, W) -> (N, C, H*scale, W*scale)."""
    N, C, H, W = x_nchw.shape
    s = scale
    # 1x1 conv + ReLU in the Pallas kernel, reading NCHW directly (free reshape, no transpose).
    x_flat = x_nchw.reshape(N, C, H * W)
    y = conv1x1_relu_nchw(x_flat, w, bias)            # (N, C*s*s, H*W), lane-dense kernel output
    # nn.PixelShuffle(scale): out[n, c, h*s+i, w*s+j] = y[n, c*s^2 + i*s + j, h, w]
    # TODO(synk): shuffle permutation done in XLA (single transpose pass); Mosaic lacks clean
    # lowering for the lane-interleaving reshape/transpose needed to fuse it into the kernel.
    y = y.reshape(N, C, s, s, H, W)                   # [n, c, i, j, h, w]
    y = jnp.transpose(y, (0, 1, 4, 2, 5, 3))          # [n, c, h, i, w, j]
    return y.reshape(N, C, H * s, W * s)


# ------------------------------ Reference --------------------------------- #
def _reference_forward(x_nchw, w, bias, scale):
    N, C, H, W = x_nchw.shape
    s = scale
    y = jnp.einsum("nqhw,oq->nohw", x_nchw, w) + bias.reshape(1, -1, 1, 1)
    y = jnp.maximum(y, 0.0)
    y = y.reshape(N, C, s, s, H, W)
    y = jnp.transpose(y, (0, 1, 4, 2, 5, 3))
    return y.reshape(N, C, H * s, W * s)


if __name__ == "__main__":
    key = jax.random.PRNGKey(0)
    k_x, k_p, k_x2 = jax.random.split(key, 3)

    # Primary test: small shapes consistent with the module (batch=2, channels=4, spatial=16).
    N, C, H, W, scale = 2, 4, 16, 16, 2
    x = jax.random.normal(k_x, (N, C, H, W), jnp.float32)
    w, bias = init_params(k_p, C, scale)

    out = jax.block_until_ready(pixel_shuffle_forward(x, w, bias, scale))
    assert out.shape == (N, C, H * scale, W * scale), out.shape
    ref = jax.block_until_ready(_reference_forward(x, w, bias, scale))
    assert jnp.allclose(out, ref, atol=1e-5, rtol=1e-5), "mismatch vs reference (divisible M)"

    # Robustness test: pixel count not a multiple of 128 (full-axis block path).
    H2, W2 = 12, 12
    x2 = jax.random.normal(k_x2, (N, C, H2, W2), jnp.float32)
    out2 = jax.block_until_ready(pixel_shuffle_forward(x2, w, bias, scale))
    assert out2.shape == (N, C, H2 * scale, W2 * scale), out2.shape
    ref2 = jax.block_until_ready(_reference_forward(x2, w, bias, scale))
    assert jnp.allclose(out2, ref2, atol=1e-5, rtol=1e-5), "mismatch vs reference (ragged M)"

    print("KERNEL_OK")
</pallas_src>

<mosaic_0001>
module attributes {stable_mosaic.version = 11 : i64} {
  func.func @kernel(%arg0: i32, %arg1: i32, %arg2: memref<1x4x256xf32, #tpu.memory_space<vmem>>, %arg3: memref<16x4xf32, #tpu.memory_space<vmem>>, %arg4: memref<16x1xf32, #tpu.memory_space<vmem>>, %arg5: memref<1x16x256xf32, #tpu.memory_space<vmem>>) attributes {dimension_semantics = [#tpu.dimension_semantics<parallel>, #tpu.dimension_semantics<parallel>], iteration_bounds = array<i64: 2, 1>, scalar_prefetch = 0 : i64, scratch_operands = 0 : i64, tpu.core_type = #tpu.core_type<tc>, window_params = [{transform_indices = @transform_0, window_bounds = array<i64: 1, 4, 256>}, {pipeline_mode = #tpu.pipeline_mode<synchronous>, transform_indices = @transform_1, window_bounds = array<i64: 16, 4>}, {pipeline_mode = #tpu.pipeline_mode<synchronous>, transform_indices = @transform_2, window_bounds = array<i64: 16, 1>}, {transform_indices = @transform_3, window_bounds = array<i64: 1, 16, 256>}]} {
    %c0 = arith.constant 0 : index
    %c0_0 = arith.constant 0 : index
    %0 = vector.load %arg4[%c0, %c0_0] : memref<16x1xf32, #tpu.memory_space<vmem>>, vector<16x1xf32>
    %1 = vector.shape_cast %0 : vector<16x1xf32> to vector<16x1xf32>
    %2 = vector.broadcast %1 : vector<16x1xf32> to vector<16x256xf32>
    %c0_1 = arith.constant 0 : index
    %c0_2 = arith.constant 0 : index
    %3 = vector.load %arg3[%c0_1, %c0_2] : memref<16x4xf32, #tpu.memory_space<vmem>>, vector<16x1xf32>
    %c0_3 = arith.constant 0 : index
    %c0_4 = arith.constant 0 : index
    %c0_5 = arith.constant 0 : index
    %4 = vector.load %arg2[%c0_3, %c0_4, %c0_5] : memref<1x4x256xf32, #tpu.memory_space<vmem>>, vector<1x1x256xf32>
    %5 = vector.shape_cast %4 : vector<1x1x256xf32> to vector<1x256xf32>
    %6 = vector.broadcast %3 : vector<16x1xf32> to vector<16x256xf32>
    %7 = vector.broadcast %5 : vector<1x256xf32> to vector<16x256xf32>
    %8 = arith.mulf %6, %7 : vector<16x256xf32>
    %9 = arith.addf %2, %8 : vector<16x256xf32>
    %c0_6 = arith.constant 0 : index
    %c1 = arith.constant 1 : index
    %10 = vector.load %arg3[%c0_6, %c1] : memref<16x4xf32, #tpu.memory_space<vmem>>, vector<16x1xf32>
    %c0_7 = arith.constant 0 : index
    %c1_8 = arith.constant 1 : index
    %c0_9 = arith.constant 0 : index
    %11 = vector.load %arg2[%c0_7, %c1_8, %c0_9] : memref<1x4x256xf32, #tpu.memory_space<vmem>>, vector<1x1x256xf32>
    %12 = vector.shape_cast %11 : vector<1x1x256xf32> to vector<1x256xf32>
    %13 = vector.broadcast %10 : vector<16x1xf32> to vector<16x256xf32>
    %14 = vector.broadcast %12 : vector<1x256xf32> to vector<16x256xf32>
    %15 = arith.mulf %13, %14 : vector<16x256xf32>
    %16 = arith.addf %9, %15 : vector<16x256xf32>
    %c0_10 = arith.constant 0 : index
    %c2 = arith.constant 2 : index
    %17 = vector.load %arg3[%c0_10, %c2] : memref<16x4xf32, #tpu.memory_space<vmem>>, vector<16x1xf32>
    %c0_11 = arith.constant 0 : index
    %c2_12 = arith.constant 2 : index
    %c0_13 = arith.constant 0 : index
    %18 = vector.load %arg2[%c0_11, %c2_12, %c0_13] : memref<1x4x256xf32, #tpu.memory_space<vmem>>, vector<1x1x256xf32>
    %19 = vector.shape_cast %18 : vector<1x1x256xf32> to vector<1x256xf32>
    %20 = vector.broadcast %17 : vector<16x1xf32> to vector<16x256xf32>
    %21 = vector.broadcast %19 : vector<1x256xf32> to vector<16x256xf32>
    %22 = arith.mulf %20, %21 : vector<16x256xf32>
    %23 = arith.addf %16, %22 : vector<16x256xf32>
    %c0_14 = arith.constant 0 : index
    %c3 = arith.constant 3 : index
    %24 = vector.load %arg3[%c0_14, %c3] : memref<16x4xf32, #tpu.memory_space<vmem>>, vector<16x1xf32>
    %c0_15 = arith.constant 0 : index
    %c3_16 = arith.constant 3 : index
    %c0_17 = arith.constant 0 : index
    %25 = vector.load %arg2[%c0_15, %c3_16, %c0_17] : memref<1x4x256xf32, #tpu.memory_space<vmem>>, vector<1x1x256xf32>
    %26 = vector.shape_cast %25 : vector<1x1x256xf32> to vector<1x256xf32>
    %27 = vector.broadcast %24 : vector<16x1xf32> to vector<16x256xf32>
    %28 = vector.broadcast %26 : vector<1x256xf32> to vector<16x256xf32>
    %29 = arith.mulf %27, %28 : vector<16x256xf32>
    %30 = arith.addf %23, %29 : vector<16x256xf32>
    %cst = arith.constant 0.000000e+00 : f32
    %31 = vector.broadcast %cst : f32 to vector<16x256xf32>
    %32 = arith.maximumf %30, %31 : vector<16x256xf32>
    %c0_18 = arith.constant 0 : index
    %c0_19 = arith.constant 0 : index
    %c0_20 = arith.constant 0 : index
    %33 = vector.load %arg5[%c0_18, %c0_19, %c0_20] : memref<1x16x256xf32, #tpu.memory_space<vmem>>, vector<1x16x256xf32>
    %34 = vector.shape_cast %33 : vector<1x16x256xf32> to vector<16x256xf32>
    %35 = vector.shape_cast %32 : vector<16x256xf32> to vector<1x16x256xf32>
    tpu.vector_store %arg5[%c0_18, %c0_19, %c0_20], %35 {strides = array<i32>} : memref<1x16x256xf32, #tpu.memory_space<vmem>>, vector<1x16x256xf32>,
    return
  }
  func.func @transform_0(%arg0: i32, %arg1: i32) -> (i32, i32, i32) {
    %c0_i32 = arith.constant 0 : i32
    %c0_i32_0 = arith.constant 0 : i32
    return %arg0, %c0_i32, %arg1 : i32, i32, i32
  }
  func.func @transform_1(%arg0: i32, %arg1: i32) -> (i32, i32) {
    %c0_i32 = arith.constant 0 : i32
    %c0_i32_0 = arith.constant 0 : i32
    %c0_i32_1 = arith.constant 0 : i32
    return %c0_i32, %c0_i32_0 : i32, i32
  }
  func.func @transform_2(%arg0: i32, %arg1: i32) -> (i32, i32) {
    %c0_i32 = arith.constant 0 : i32
    %c0_i32_0 = arith.constant 0 : i32
    %c0_i32_1 = arith.constant 0 : i32
    return %c0_i32, %c0_i32_0 : i32, i32
  }
  func.func @transform_3(%arg0: i32, %arg1: i32) -> (i32, i32, i32) {
    %c0_i32 = arith.constant 0 : i32
    %c0_i32_0 = arith.constant 0 : i32
    return %arg0, %c0_i32, %arg1 : i32, i32, i32
  }
}

</mosaic_0001>

<bundles_post_ra>
// kernel: tpu_custom_call.1
= control target key start
LH: loop header
LB: loop body
LE: loop exit
PB: predicated region body
PF: predicated region fallthrough
CT: control target
= control target key end

     0   :  { %8 = vsyncpa [#allocation3], 0  ;;  %s756_s0 = inlined_call_operand.vmem [shape: f32[2,4,256], index: 0, kind: input, shape index: {}]   ;;  %s757_s1 = inlined_call_operand.vmem [shape: f32[16,4], index: 1, kind: input, shape index: {}]   ;;  %s758_s2 = inlined_call_operand.vmem [shape: f32[16,1], index: 2, kind: input, shape index: {}]   ;;  %s759_s3 = inlined_call_operand.hbm [shape: f32[2,16,256], index: 3, kind: output, shape index: {}]  }
   0x1   :  { %10 = vsyncpa [#allocation3 + $0x1], 0  ;;  %s626_s12 = smov 0   ;;  %s628_s13 = smov 0  }
   0x2   :  { %s630_s14 = smov 0   ;;  %s632_s15 = smov 0  }
   0x3   :  { %s634_s16 = smov 0   ;;  %s636_s17 = smov 0  }
   0x4 LB: > { %s434_s18 = sadd.s32 4294967295, %s597_s17   ;;  %s435_s19 = sadd.s32 4294967294, %s597_s17   ;;  %s597_s17 = sphi %s636_s17, %s16_s17   ;;  %s593_s16 = sphi %s634_s16, %s766_s16   ;;  %s589_s15 = sphi %s632_s15, %s765_s15   ;;  %s585_s14 = sphi %s630_s14, %s764_s14   ;;  %s581_s13 = sphi %s628_s13, %s763_s13   ;;  %s577_s12 = sphi %s626_s12, %s762_s12  }
   0x5   : > { %s28_s20 = sadd.s32 1, %s593_s16  ;;  %s107_s21 = sadd.s32 1, %s585_s14 }
   0x6   : > { %p30_p0 = scmp.ge.s32.totalorder %s28_s20, 2  ;;  %p117_p1 = scmp.ne.s32.totalorder %s585_s14, %s581_s13 }
   0x7   : > { %p118_p2 = scmp.eq.s32.totalorder %s434_s18, 1  ;;  %p123_p3 = scmp.ne.s32.totalorder %s581_s13, %s577_s12 }
   0x8   : > { %s768_s20 = smov (%p30_p0, %s28_s20), 0  ;;  %p124_p5 = scmp.eq.s32.totalorder %s435_s19, 1 }
   0x9   : > { %p666_p4 = por %p118_p2, %p117_p1  ;;  %s102_s23 = ssub.s32 %s593_s16, %s768_s20 }
   0xa   : > { %p438_p6 = scmp.ge.s32.totalorder %s597_s17, 1  ;;  %p105_p7 = scmp.eq.s32.totalorder %s102_s23, 0 }
   0xb   : > { %p673_p8 = por %p124_p5, %p123_p3  ;;  %p161_p9 = scmp.lt.s32.totalorder %s597_s17, 3 }
   0xc   : > { %s679_s25 = scalar_select %p105_p7, %s585_s14, %s107_s21  }
   0xd   : > { %p162_p10 = pnand %p438_p6, %p161_p9 }
   0xe   : > { %p190_p11 = scmp.lt.s32.totalorder (!%p162_p10), %s589_s15, 1  ;;  %s186_s18 = sand.u32 (!%p162_p10), 1, %s581_s13  }
   0xf   : > { %165 = sbr.rel (%p162_p10) target bundleno = 189 (0xbd), region = 32  ;;  %s439_s19 = sshll.u32 (!%p162_p10), %s186_s18, 5 }
  0x10   : > { %s188_s21 = scalar_lea.vmem (!%p162_p10), [#allocation2], %s439_s19  ;;  %s451_s26 = sshll.u32 (!%p162_p10), %s589_s15, 9 }
  0x11   : > { %s355_s23 = sshll.u32 (!%p162_p10), %s188_s21, 4  ;;  %s707_s29 = scalar_lea.hbm (!%p162_p10), %s759_s3, %s451_s26  ;;  %s702_s23 = int_to_ptr.vmem [resolvable:$true] %s355_s23 }
  0x12   : > { %s521_s30 = scalar_lea.vmem (!%p162_p10), %s702_s23, 512  ;;  %s603_s4 = smov (!%p162_p10), [#allocation2]  }
  0x13   : > { %p522_p12 = scmp.ne.s32.totalorder (!%p162_p10), %s702_s23, %s521_s30  ;;  %s525_s5 = sshll.u32 (!%p162_p10), %s603_s4, 4  ;;  %s526_s5 = int_to_ptr.vmem [resolvable:$false] %s525_s5 }
  0x14   : > { %v212_v0 = vld [vmem:[%s757_s1] sm:$0xff]  ;;  %v599_v2 = vmov 0   ;;  %v213_v3 = vld [vmem:[%s757_s1 + $0x8] sm:$0xff]  ;;  %v600_v5 = vmov 1   ;;  %v601_v6 = vmov 2   ;;  %v602_v7 = vmov 3   ;;  %p528_p1 = scmp.lt.s32.totalorder %s702_s23, %s526_s5 }
  0x15   : > { %v200_v1 = vld [vmem:[%s758_s2] sm:$0xff]  ;;  %514 = vset.pattern.permute.xlu1 %v599_v2  ;;  %513 = vset.pattern.permute.xlu0 %v599_v2  ;;  %v201_v4 = vld [vmem:[%s758_s2 + $0x8] sm:$0xff]  ;;  %s191_s7 = scalar_select %p190_p11, %s589_s15, 1  ;;  %v226_v8 = vlaneseq }
  0x16   : > { %217 = vperm.xlu0 %513, %v212_v0   ;;  %204 = vperm.xlu1 %514, %v200_v1   ;;  %s711_s15 = scalar_lea.sflag [#allocation3], %s186_s18  ;;  %p523_p13 = pnand %p522_p12, %p666_p4 }
  0x17   : > { %s450_s8 = sshll.u32 %s191_s7, 3  ;;  %v227_v9 = vshrl.u32 %v226_v8, 7  ;;  %s527_s6 = scalar_lea.vmem %s526_s5, 1024 }
  0x18   : > { %s197_s11 = scalar_lea.vmem %s756_s0, %s450_s8  ;;  %p524_p0 = pneg %p523_p13 }
  0x19   : > { %v228_v12 = vsub.s32 0, %v227_v9  ;;  %v232_v13 = vsub.s32 1, %v227_v9  ;;  %v214_v16 = vld [vmem:[%s197_s11] ss:$4 sm:$0x3]  ;;  %p529_p2 = scmp.lt.s32.totalorder %s527_s6, %s521_s30 }
  0x1a   : > { %222 = vperm.xlu0 %513, %v213_v3   ;;  %209 = vperm.xlu1 %514, %v201_v4   ;;  %v442_v17 = vld [vmem:[%s197_s11 + $0x1] ss:$4 sm:$0x3]  ;;  %v443_v21 = vld [vmem:[%s197_s11 + $0x2] ss:$4 sm:$0x3] }
  0x1b   : > { %v229_v18 = vrot.slane %v214_v16, %v228_v12  ;;  %v233_v19 = vrot.slane %v214_v16, %v232_v13  ;;  %v258_v23 = vrot.slane %v442_v17, %v228_v12  ;;  %v262_v24 = vrot.slane %v442_v17, %v232_v13  ;;  %v444_v29 = vld [vmem:[%s197_s11 + $0x3] ss:$4 sm:$0x3]  ;;  %p530_p3 = por %p529_p2, %p528_p1 }
  0x1c   : > { %v287_v27 = vrot.slane %v443_v21, %v228_v12  ;;  %v291_v28 = vrot.slane %v443_v21, %v232_v13  ;;  %v316_v35 = vrot.slane %v444_v29, %v228_v12  ;;  %v320_v36 = vrot.slane %v444_v29, %v232_v13 }
  0x1d   : > { %p531_p5 = pnand %p530_p3, %p524_p0 }
  0x1e   : > { %515 = vset.pattern.permute.xlu0 %v600_v5  ;;  %516 = vset.pattern.permute.xlu1 %v600_v5 }
  0x1f   : > { %247 = vperm.xlu0 %515, %v212_v0   ;;  %251 = vperm.xlu1 %516, %v213_v3  }
  0x23   : > { %518 = vset.pattern.permute.xlu0 %v601_v6  ;;  %517 = vset.pattern.permute.xlu1 %v601_v6 }
  0x24   : > { %280 = vperm.xlu0 %518, %v213_v3   ;;  %276 = vperm.xlu1 %517, %v212_v0  }
  0x28   : > { %519 = vset.pattern.permute.xlu1 %v602_v7  ;;  %520 = vset.pattern.permute.xlu0 %v602_v7 }
  0x29   : > { %305 = vperm.xlu1 %519, %v212_v0  }
  0x2d   : > { %309 = vperm.xlu1 %519, %v213_v3  }
  0x91   : > { %v218_v10 = vpop.permute.xlu0 %217  ;;  %v205_v11 = vpop.permute.xlu1 %204 }
  0x92   : > { %v236_v25 = vmul.f32 %v229_v18, %v218_v10  ;;  %v237_v26 = vmul.f32 %v233_v19, %v218_v10 }
  0x94   : > { %v240_v37 = vadd.f32 %v236_v25, %v205_v11  ;;  %v241_v38 = vadd.f32 %v237_v26, %v205_v11 }
  0x95   : > { %v223_v14 = vpop.permute.xlu0 %222  ;;  %v210_v15 = vpop.permute.xlu1 %209 }
  0x96   : > { %v238_v33 = vmul.f32 %v229_v18, %v223_v14  ;;  %v239_v34 = vmul.f32 %v233_v19, %v223_v14 }
  0x98   : > { %v242_v46 = vadd.f32 %v238_v33, %v210_v15  ;;  %v243_v47 = vadd.f32 %v239_v34, %v210_v15 }
  0x9a   : > { %v252_v20 = vpop.permute.xlu1 %251  ;;  %v248_v22 = vpop.permute.xlu0 %247 }
  0x9b   : > { %v265_v30 = vmul.f32 %v258_v23, %v248_v22  ;;  %v266_v31 = vmul.f32 %v262_v24, %v248_v22  ;;  %v267_v42 = vmul.f32 %v258_v23, %v252_v20  ;;  %v268_v43 = vmul.f32 %v262_v24, %v252_v20 }
  0x9d   : > { %v269_v44 = vadd.f32 %v265_v30, %v240_v37  ;;  %v270_v45 = vadd.f32 %v266_v31, %v241_v38  ;;  %v271_v55 = vadd.f32 %v267_v42, %v242_v46  ;;  %v272_v56 = vadd.f32 %v268_v43, %v243_v47 }
  0x9f   : > { %v277_v32 = vpop.permute.xlu1 %276  ;;  %v281_v39 = vpop.permute.xlu0 %280 }
  0xa0   : > { %v294_v40 = vmul.f32 %v287_v27, %v277_v32  ;;  %v295_v41 = vmul.f32 %v291_v28, %v277_v32  ;;  %v296_v48 = vmul.f32 %v287_v27, %v281_v39  ;;  %v297_v49 = vmul.f32 %v291_v28, %v281_v39 }
  0xa2   : > { %v298_v51 = vadd.f32 %v294_v40, %v269_v44  ;;  %v299_v52 = vadd.f32 %v295_v41, %v270_v45  ;;  %v300_v59 = vadd.f32 %v296_v48, %v271_v55  ;;  %v301_v60 = vadd.f32 %v297_v49, %v272_v56 }
  0xa4   : > { %v306_v50 = vpop.permute.xlu1 %305 }
  0xa5   : > { %v323_v53 = vmul.f32 %v316_v35, %v306_v50  ;;  %v324_v54 = vmul.f32 %v320_v36, %v306_v50 }
  0xa7   : > { %v327_v57 = vadd.f32 %v323_v53, %v298_v51  ;;  %v328_v58 = vadd.f32 %v324_v54, %v299_v52 }
  0xa8   : > { %v310_v61 = vpop.permute.xlu1 %309 }
  0xa9   : > { %v331_v62 = vmax.f32 %v327_v57, 0.0  ;;  %v332_v63 = vmax.f32 %v328_v58, 0.0  ;;  %v325_v0 = vmul.f32 %v316_v35, %v310_v61  ;;  %v326_v1 = vmul.f32 %v320_v36, %v310_v61 }
  0xab   : > { %335 = vst [vmem:[%s188_s21] sm:$0xff] %v331_v62  ;;  %336 = vst [vmem:[%s188_s21 + $0x8] sm:$0xff] %v332_v63  ;;  %v329_v2 = vadd.f32 %v325_v0, %v300_v59  ;;  %v330_v3 = vadd.f32 %v326_v1, %v301_v60 }
  0xad   : > { %v333_v4 = vmax.f32 %v329_v2, 0.0  ;;  %v334_v5 = vmax.f32 %v330_v3, 0.0 }
  0xaf   : > { %337 = vst [vmem:[%s188_s21 + $0x10] sm:$0xff] %v333_v4  ;;  %338 = vst [vmem:[%s188_s21 + $0x18] sm:$0xff] %v334_v5 }
  0xb0   : > { %534 = shalt.err (!%p531_p5)
}
  0xb1   : > { %s535_s7 = scalar_lea.hbm %s707_s29, 512  ;;  %s539_s10 = scalar_lea.hbm %s759_s3, 1024 }
  0xb2   : > { %p536_p6 = scmp.ne.s32.totalorder %s707_s29, %s535_s7  ;;  %p540_p10 = scmp.lt.s32.totalorder %s707_s29, %s759_s3 }
  0xb3   : > { %p541_p11 = scmp.lt.s32.totalorder %s539_s10, %s535_s7 }
  0xb4   : > { %p537_p7 = pnand %p536_p6, %p666_p4 }
  0xb5   : > { %p542_p12 = por %p541_p11, %p540_p10 }
  0xb6   : > { %p538_p9 = pneg %p537_p7 }
  0xb8   : > { %p543_p13 = pnand %p542_p12, %p538_p9 }
  0xba   : > { %546 = shalt.err (!%p543_p13)
}
  0xbb   : > { %s604_s19 = smov 256   ;;  %s605_s21 = smov 16  }
  0xbc   : > { %452 = dma.vmem_to_hbm [thread:$0]  (%p666_p4), %s702_s23, 512, %s707_s29, %s711_s15, %s604_s19, %s604_s19, %s605_s21  }
  0xbd PF: > { %p458_p0 = scmp.ge.s32.totalorder %s597_s17, 2  ;;  %s370_s26 = sand.u32 1, %s577_s12  }
  0xbe   : > { %s371_s27 = scalar_lea.sflag [#allocation3], %s370_s26 }
  0xbf   : > { %p455_p1 = pnand %p458_p0, %p673_p8 }
  0xc1   : > { %p456_p2 = pneg %p455_p1 }
  0xc3   : > { %572 = dma.done.wait (%p456_p2), %s371_s27, 512  }
  0xc4   : > { %574 = vsyncadd (%p456_p2), %s371_s27, 4294966784  ;;  %s16_s17 = sadd.s32 1, %s597_s17   ;;  %s762_s12 = smov %s581_s13 }
  0xc5   : > { %p13_p3 = scmp.ge.s32.totalorder %s16_s17, 4   ;;  %s763_s13 = smov %s585_s14 }
  0xc6   : > { %s764_s14 = smov %s679_s25  ;;  %s765_s15 = smov %s593_s16 }
  0xc7   : > { %s766_s16 = smov %s768_s20  ;;  %15 = sbr.rel (!%p13_p3) target bundleno = 4 (0x4), region = 70 }
  0xcc   :  { %376 = vsyncpa [#allocation3], 1 }
  0xcd   :  { %378 = vsyncpa [#allocation3 + $0x1], 1 }

</bundles_post_ra>
